<compile_context>
chip_gen: v5e
topology: v5e:2x2
jax: 0.10.0
libtpu: 0.0.40
codegen_flags: <defaults>
</compile_context>

<pallas_src>
import jax
import jax.numpy as jnp
from jax.experimental import pallas as pl
from jax.experimental.pallas import tpu as pltpu


def _celu_smooth_relu_kernel(x_ref, o_ref):
    # Exactly equivalent to celu(x) + (relu(x) - celu(x)) for the forward value.
    o_ref[...] = jnp.maximum(x_ref[...], 0).astype(o_ref.dtype)


def _pick_block_bytes():
    """Return (target_block_bytes, vmem_limit_bytes or None), gated by chip."""
    vmem = None
    try:
        vmem = int(pltpu.get_tpu_info().vmem_capacity_bytes)
    except Exception:
        pass
    if vmem is None:
        try:
            kind = jax.devices()[0].device_kind.lower()
            if "v7" in kind:
                vmem = 64 * 1024 * 1024
        except Exception:
            pass
    if vmem is not None and vmem <= 80 * 1024 * 1024:
        # v7x-class: only 64 MiB physical VMEM but ~3.2 TB/s HBM, so bigger
        # blocks amortize the ~0.35 us per-grid-step cost. 4 live buffers
        # (in+out, double-buffered) = 16 MiB; set the scoped limit explicitly
        # with headroom, still well under the 64 MiB physical cap.
        return 4 * 1024 * 1024, 24 * 1024 * 1024
    # v5e / v6e: 2 MiB is already on the measured HBM-roofline plateau and the
    # 4 live buffers (8 MiB) fit v5e's 16 MiB scoped-VMEM default untouched.
    return 2 * 1024 * 1024, None


def celu_smooth_relu(x):
    """x: any-shape float array (e.g. NCHW). Returns same shape/dtype.

    NOTE: as a standalone op this is a pure 1R+1W HBM stream; when it sits
    between other XLA ops, prefer exposing it as jnp.maximum(x, 0) (or fusing
    it into the neighboring kernel) so the HBM round trip disappears.
    """
    orig_shape = x.shape
    orig_dtype = x.dtype
    n_elem = int(x.size)
    if n_elem == 0:
        return x
    dtype_bytes = jnp.dtype(orig_dtype).itemsize
    # Sublane packing granularity: f32 -> 8, bf16/f16 -> 16, int8/fp8 -> 32.
    sublane_mult = max(8, 32 // dtype_bytes)

    target_block_bytes, vmem_limit = _pick_block_bytes()
    cp_kwargs = dict(dimension_semantics=("parallel",))  # megacore-shardable
    if vmem_limit is not None:
        cp_kwargs["vmem_limit_bytes"] = vmem_limit
    compiler_params = pltpu.CompilerParams(**cp_kwargs)

    cost = pl.CostEstimate(
        flops=n_elem,
        transcendentals=0,
        bytes_accessed=2 * n_elem * dtype_bytes,
    )

    # Common case: pick the widest lane-dense last dim that divides n_elem so
    # the reshape is a free metadata change (no extra HBM pass).
    lane_width = None
    for w in (1024, 512, 256, 128):
        if n_elem % w == 0:
            lane_width = w
            break

    if lane_width is not None:
        rows = n_elem // lane_width
        x2d = x.reshape(rows, lane_width)

        target_rows = target_block_bytes // (lane_width * dtype_bytes)
        target_rows = max(sublane_mult, (target_rows // sublane_mult) * sublane_mult)
        if target_rows >= rows:
            if rows >= 2 * sublane_mult:
                # Split into up to 4 sublane-aligned steps so the pipeline and
                # (on v7x) both TensorCores get used for mid-size inputs.
                quarter = pl.cdiv(rows, 4)
                block_rows = ((quarter + sublane_mult - 1) // sublane_mult) * sublane_mult
                block_rows = min(block_rows, rows)
            else:
                block_rows = rows  # tiny input: single full-extent block
        else:
            block_rows = target_rows
        grid = (pl.cdiv(rows, block_rows),)  # partial last block is masked

        out2d = pl.pallas_call(
            _celu_smooth_relu_kernel,
            out_shape=jax.ShapeDtypeStruct((rows, lane_width), orig_dtype),
            grid_spec=pltpu.PrefetchScalarGridSpec(
                num_scalar_prefetch=0,
                grid=grid,
                in_specs=[pl.BlockSpec((block_rows, lane_width), lambda i: (i, 0))],
                out_specs=pl.BlockSpec((block_rows, lane_width), lambda i: (i, 0)),
            ),
            compiler_params=compiler_params,
            cost_estimate=cost,
        )(x2d)
        return out2d.reshape(orig_shape)

    # Ragged fallback (n_elem not a multiple of 128): run 1-D with a
    # lane-dense block and a masked partial last block -- no host-side pad,
    # no trailing slice, so no extra HBM passes.
    x1d = x.reshape(-1)
    chunk = 8 * 128
    block_elems = max(chunk, ((target_block_bytes // dtype_bytes) // chunk) * chunk)
    if block_elems >= n_elem:
        block_elems = n_elem  # full-extent block is always legal
    grid = (pl.cdiv(n_elem, block_elems),)

    out1d = pl.pallas_call(
        _celu_smooth_relu_kernel,
        out_shape=jax.ShapeDtypeStruct((n_elem,), orig_dtype),
        grid_spec=pltpu.PrefetchScalarGridSpec(
            num_scalar_prefetch=0,
            grid=grid,
            in_specs=[pl.BlockSpec((block_elems,), lambda i: (i,))],
            out_specs=pl.BlockSpec((block_elems,), lambda i: (i,)),
        ),
        compiler_params=compiler_params,
        cost_estimate=cost,
    )(x1d)
    return out1d.reshape(orig_shape)


if __name__ == "__main__":
    key = jax.random.PRNGKey(0)
    # Small NCHW input consistent with the activation module.
    x = jax.random.normal(key, (2, 4, 16, 16), dtype=jnp.float32)

    out = celu_smooth_relu(x)
    out = jax.block_until_ready(out)

    # Reference: celu(x) + (relu(x) - celu(x)) == relu(x) exactly.
    x_celu = jnp.where(x > 0, x, jnp.expm1(x))
    ref = x_celu + (jnp.maximum(x, 0.0) - x_celu)
    assert out.shape == x.shape and out.dtype == x.dtype
    assert jnp.allclose(out, ref, atol=1e-6, rtol=1e-6)

    print("KERNEL_OK")
</pallas_src>

<mosaic_0001>
module attributes {stable_mosaic.version = 11 : i64} {
  func.func @_celu_smooth_relu_kernel(%arg0: i32, %arg1: memref<2x1024xf32, #tpu.memory_space<vmem>>, %arg2: memref<2x1024xf32, #tpu.memory_space<vmem>>) attributes {dimension_semantics = [#tpu.dimension_semantics<parallel>], iteration_bounds = array<i64: 1>, scalar_prefetch = 0 : i64, scratch_operands = 0 : i64, tpu.core_type = #tpu.core_type<tc>, window_params = [{transform_indices = @transform_0, window_bounds = array<i64: 2, 1024>}, {transform_indices = @transform_1, window_bounds = array<i64: 2, 1024>}]} {
    %c0 = arith.constant 0 : index
    %c0_0 = arith.constant 0 : index
    %0 = vector.load %arg1[%c0, %c0_0] : memref<2x1024xf32, #tpu.memory_space<vmem>>, vector<2x1024xf32>
    %cst = arith.constant 0.000000e+00 : f32
    %1 = vector.broadcast %cst : f32 to vector<2x1024xf32>
    %2 = arith.maximumf %0, %1 : vector<2x1024xf32>
    %c0_1 = arith.constant 0 : index
    %c0_2 = arith.constant 0 : index
    %3 = vector.load %arg2[%c0_1, %c0_2] : memref<2x1024xf32, #tpu.memory_space<vmem>>, vector<2x1024xf32>
    tpu.vector_store %arg2[%c0_1, %c0_2], %2 {strides = array<i32>} : memref<2x1024xf32, #tpu.memory_space<vmem>>, vector<2x1024xf32>,
    return
  }
  func.func @transform_0(%arg0: i32) -> (i32, i32) {
    %c0_i32 = arith.constant 0 : i32
    %c0_i32_0 = arith.constant 0 : i32
    return %arg0, %c0_i32 : i32, i32
  }
  func.func @transform_1(%arg0: i32) -> (i32, i32) {
    %c0_i32 = arith.constant 0 : i32
    %c0_i32_0 = arith.constant 0 : i32
    return %arg0, %c0_i32 : i32, i32
  }
}

</mosaic_0001>

<bundles_post_ra>
// kernel: tpu_custom_call.1
= control target key start
LH: loop header
LB: loop body
LE: loop exit
PB: predicated region body
PF: predicated region fallthrough
CT: control target
= control target key end

     0   :  { %6 = vsyncpa [#allocation3], 0  ;;  %s118_s0 = inlined_call_operand.hbm [shape: f32[2,1024], index: 0, kind: input, shape index: {}]   ;;  %s119_s1 = inlined_call_operand.hbm [shape: f32[2,1024], index: 1, kind: output, shape index: {}]  }
   0x1   :  { %7 = vsyncpa [#allocation4], 0  ;;  %s13_s8 = sshll.u32 %s118_s0, 4  ;;  %s100_s9 = smov [#allocation2]   ;;  %s14_s8 = int_to_ptr.hbm [resolvable:$true] %s13_s8 }
   0x2   :  { %s15_s10 = sshll.u32 %s100_s9, 4  ;;  %s16_s10 = int_to_ptr.vmem [resolvable:$true] %s15_s10 }
   0x3   :  { %18 = dma.hbm_to_vmem [thread:$0]  %s14_s8, 256, %s16_s10, [#allocation3]  }
   0x4   :  { %96 = dma.done.wait [#allocation3], 256  }
   0x5   :  { %97 = vsyncadd [#allocation3], 4294967040  ;;  %s101_s11 = smov [#allocation5]   ;;  %s36_s15 = sshll.u32 %s119_s1, 4  ;;  %v23_v0 = vld [vmem:[#allocation2] sm:$0xff]  ;;  %v24_v1 = vld [vmem:[#allocation2 + $0x8] sm:$0xff]  ;;  %s37_s15 = int_to_ptr.hbm [resolvable:$true] %s36_s15 }
   0x6   :  { %s34_s12 = sshll.u32 %s101_s11, 4  ;;  %v25_v2 = vmax.f32 %v23_v0, 0.0  ;;  %v26_v3 = vmax.f32 %v24_v1, 0.0  ;;  %s35_s12 = int_to_ptr.vmem [resolvable:$true] %s34_s12 }
   0x8   :  { %27 = vst [vmem:[#allocation5] sm:$0xff] %v25_v2 }
   0x9   :  { %28 = vst [vmem:[#allocation5 + $0x8] sm:$0xff] %v26_v3 }
   0xa   :  { %39 = dma.vmem_to_hbm [thread:$0]  %s35_s12, 256, %s37_s15, [#allocation4]  }
   0xb   :  { %98 = dma.done.wait [#allocation4], 256  }
   0xc   :  { %99 = vsyncadd [#allocation4], 4294967040 }
   0xd   :  { %44 = vsyncpa [#allocation3], 1 }
   0xe   :  { %45 = vsyncpa [#allocation4], 1 }

</bundles_post_ra>
